<compile_context>
chip_gen: v7x
topology: tpu7x:2x2x1
jax: 0.10.0
libtpu: 0.0.40
codegen_flags: <defaults>
</compile_context>

<pallas_src>
import functools

import numpy as np
import jax
import jax.numpy as jnp
from jax import lax
from jax.experimental import pallas as pl
from jax.experimental.pallas import tpu as pltpu


def _pick_q_tile(L):
    """Largest query tile (multiple of 8, <=512) that divides L, else L."""
    for tq in (512, 256, 128, 64, 32, 16, 8):
        if L % tq == 0:
            return tq
    return L


def _pick_vmem_limit_bytes():
    """Right-size the scoped VMEM limit per generation: ~100 MiB on v5e/v6e
    (128 MiB physical), ~56 MiB on v7x (64 MiB physical)."""
    cap = None
    try:
        info = pltpu.get_tpu_info()
        cap = getattr(info, "vmem_capacity_bytes", None)
    except Exception:
        cap = None
    if not cap:
        cap = 64 * 1024 * 1024          # conservative fallback (v7x-sized)
    return int(min(cap - cap // 8, 100 * 1024 * 1024))


def _encoder_block_kernel(xq_ref, xf_ref, wq_ref, bq_ref, wkv_ref, bkv_ref,
                          wo_ref, bo_ref, g1_ref, be1_ref, w1_ref, b1_ref,
                          w2_ref, b2_ref, g2_ref, be2_ref, out_ref, ctx_ref,
                          *, head_count):
    _, TQ, D = xq_ref.shape
    H = head_count
    hd = D // H
    eps = 1e-5
    mm = wq_ref.dtype                     # MXU operand dtype (weights pre-cast)

    xq = xq_ref[0]                        # (TQ, D) f32 — this program's query rows
    xf = xf_ref[0]                        # (L,  D) f32 — full sequence (for K/V)

    # ---- projections (1/sqrt(hd) already folded into wq/bq) ----------------
    q = jnp.dot(xq.astype(mm), wq_ref[...],
                preferred_element_type=jnp.float32) + bq_ref[...]        # (TQ, D)
    kv = jnp.dot(xf.astype(mm), wkv_ref[...],
                 preferred_element_type=jnp.float32) + bkv_ref[...]      # (L, 2D)

    # ---- per-head attention; contexts written to a VMEM slab at static
    #      column offsets (no concatenate / lane relayout) --------------------
    for h in range(H):
        qh = q[:, h * hd:(h + 1) * hd].astype(mm)                        # (TQ, hd)
        kh = kv[:, h * hd:(h + 1) * hd].astype(mm)                       # (L, hd)
        vh = kv[:, D + h * hd:D + (h + 1) * hd].astype(mm)               # (L, hd)
        # scores = q @ k^T (MXU NT matmul, f32 accumulation)
        s = lax.dot_general(qh, kh, (((1,), (1,)), ((), ())),
                            preferred_element_type=jnp.float32)          # (TQ, L)
        m = jnp.max(s, axis=-1, keepdims=True)
        e = jnp.exp(s - m)
        inv = pl.reciprocal(jnp.sum(e, axis=-1, keepdims=True), approx=True)
        attn = (e * inv).astype(mm)
        ctx_ref[:, h * hd:(h + 1) * hd] = jnp.dot(
            attn, vh, preferred_element_type=jnp.float32).astype(ctx_ref.dtype)

    # ---- single output projection, bias added exactly once ------------------
    att = jnp.dot(ctx_ref[...], wo_ref[...],
                  preferred_element_type=jnp.float32) + bo_ref[...]      # (TQ, D)

    # ---- residual + LayerNorm 1 (f32) ----------------------------------------
    h1 = att + xq
    mu = jnp.mean(h1, axis=-1, keepdims=True)
    var = jnp.mean((h1 - mu) ** 2, axis=-1, keepdims=True)
    h0 = (h1 - mu) * lax.rsqrt(var + eps) * g1_ref[...] + be1_ref[...]

    # ---- feed-forward (the reference module applies no nonlinearity) ---------
    f = jnp.dot(h0.astype(mm), w1_ref[...],
                preferred_element_type=jnp.float32) + b1_ref[...]
    f = jnp.dot(f.astype(mm), w2_ref[...],
                preferred_element_type=jnp.float32) + b2_ref[...]

    # ---- residual + LayerNorm 2 (f32) ----------------------------------------
    h2 = f + h0
    mu2 = jnp.mean(h2, axis=-1, keepdims=True)
    var2 = jnp.mean((h2 - mu2) ** 2, axis=-1, keepdims=True)
    out = (h2 - mu2) * lax.rsqrt(var2 + eps) * g2_ref[...] + be2_ref[...]

    out_ref[0] = out.astype(out_ref.dtype)


def prepare_params(params, head_count, matmul_dtype=jnp.bfloat16):
    """One-time param prep (call OUTSIDE the per-step forward):
      * fold 1/sqrt(hd) into Wq / bq,
      * fuse Wk/Wv (and biases) into a single (D, 2D) weight,
      * pre-cast weight matrices to `matmul_dtype` (bf16 is the right choice on
        v5e, v6e and v7x: MXUs are bf16-native; accumulation stays f32 and
        biases / LayerNorm params stay f32)."""
    D = params['wq'].shape[0]
    hd = D // head_count
    scale = 1.0 / float(np.sqrt(hd))
    mm = matmul_dtype
    return dict(
        wq=(params['wq'] * scale).astype(mm),
        bq=params['bq'] * scale,
        wkv=jnp.concatenate([params['wk'], params['wv']], axis=1).astype(mm),
        bkv=jnp.concatenate([params['bk'], params['bv']], axis=1),
        wo=params['wo'].astype(mm), bo=params['bo'],
        g1=params['g1'], be1=params['be1'],
        w1=params['w1'].astype(mm), b1=params['b1'],
        w2=params['w2'].astype(mm), b2=params['b2'],
        g2=params['g2'], be2=params['be2'],
    )


@functools.partial(jax.jit, static_argnames=("head_count",))
def transformer_encoder_block(x_lbd, prepared, head_count):
    """x_lbd: (L, B, D) as in the PyTorch module. Returns (L, B, D) float32.
    `prepared` comes from prepare_params (weights already fused/scaled/cast)."""
    L, B, D = x_lbd.shape
    # TODO(synk): fold this (L,B,D)->(B,L,D) permutation into the x BlockSpec;
    # for now it is a single cheap XLA transpose outside the kernel.
    x_bld = jnp.transpose(x_lbd, (1, 0, 2))

    TQ = _pick_q_tile(L)
    nQ = L // TQ
    p = prepared

    args = (x_bld, x_bld,                       # query-tile view, full-seq view
            p['wq'], p['bq'], p['wkv'], p['bkv'], p['wo'], p['bo'],
            p['g1'], p['be1'], p['w1'], p['b1'], p['w2'], p['b2'],
            p['g2'], p['be2'])

    def resident(a):
        # Same block index at every grid step -> DMA'd once, stays in VMEM.
        return pl.BlockSpec(a.shape, lambda b, q, n=a.ndim: (0,) * n)

    in_specs = ([pl.BlockSpec((1, TQ, D), lambda b, q: (b, q, 0)),   # query rows
                 pl.BlockSpec((1, L, D), lambda b, q: (b, 0, 0))]    # full seq (K/V)
                + [resident(a) for a in args[2:]])
    out_spec = pl.BlockSpec((1, TQ, D), lambda b, q: (b, q, 0))

    kernel = functools.partial(_encoder_block_kernel, head_count=head_count)

    out = pl.pallas_call(
        kernel,
        out_shape=jax.ShapeDtypeStruct((B, L, D), jnp.float32),
        grid_spec=pltpu.PrefetchScalarGridSpec(
            num_scalar_prefetch=0,
            grid=(B, nQ),
            in_specs=in_specs,
            out_specs=out_spec,
            scratch_shapes=[pltpu.VMEM((TQ, D), p['wq'].dtype)]),     # ctx slab
        compiler_params=pltpu.CompilerParams(
            dimension_semantics=("parallel", "parallel"),   # megacore-shardable
            vmem_limit_bytes=_pick_vmem_limit_bytes()),
    )(*args)
    return jnp.transpose(out, (1, 0, 2))


def init_params(key, model_dim, head_count, ffn_dim):
    """Deterministic synthetic init; shapes follow the PyTorch module."""
    D, F = model_dim, ffn_dim

    def lin(k, fan_in, fan_out):
        bound = 1.0 / np.sqrt(fan_in)
        kw, kb = jax.random.split(k)
        w = jax.random.uniform(kw, (fan_in, fan_out), jnp.float32, -bound, bound)
        b = jax.random.uniform(kb, (1, fan_out), jnp.float32, -bound, bound)
        return w, b

    ks = jax.random.split(key, 8)
    # Per-head Linear(D, D//H) weights stacked along output columns -> (D, D).
    wq, bq = lin(ks[0], D, D)
    wk, bk = lin(ks[1], D, D)
    wv, bv = lin(ks[2], D, D)
    wo, bo = lin(ks[3], D, D)
    w1, b1 = lin(ks[4], D, F)
    w2, b2 = lin(ks[5], F, D)
    g1 = 1.0 + 0.1 * jax.random.normal(ks[6], (1, D), jnp.float32)
    be1 = 0.1 * jax.random.normal(jax.random.fold_in(ks[6], 1), (1, D), jnp.float32)
    g2 = 1.0 + 0.1 * jax.random.normal(ks[7], (1, D), jnp.float32)
    be2 = 0.1 * jax.random.normal(jax.random.fold_in(ks[7], 1), (1, D), jnp.float32)
    return dict(wq=wq, bq=bq, wk=wk, bk=bk, wv=wv, bv=bv, wo=wo, bo=bo,
                g1=g1, be1=be1, w1=w1, b1=b1, w2=w2, b2=b2, g2=g2, be2=be2)


def ref_transformer_encoder_block(x_lbd, p, head_count):
    """Pure-JAX reference mirroring the PyTorch forward exactly ((L,B,D) layout)."""
    L, B, D = x_lbd.shape
    hd = D // head_count

    def ln(h, g, b):
        mu = jnp.mean(h, axis=-1, keepdims=True)
        var = jnp.mean((h - mu) ** 2, axis=-1, keepdims=True)
        return (h - mu) / jnp.sqrt(var + 1e-5) * g + b

    q = x_lbd @ p['wq'] + p['bq'][0]
    k = x_lbd @ p['wk'] + p['bk'][0]
    v = x_lbd @ p['wv'] + p['bv'][0]
    outs = []
    for h in range(head_count):
        sl = slice(h * hd, (h + 1) * hd)
        s = jnp.einsum('imk,jmk->imj', q[..., sl], k[..., sl]) / np.sqrt(hd)
        a = jax.nn.softmax(s, axis=2)
        outs.append(jnp.einsum('imj,jmk->imk', a, v[..., sl]))
    att = jnp.concatenate(outs, axis=2) @ p['wo'] + p['bo'][0]
    h0 = ln(att + x_lbd, p['g1'][0], p['be1'][0])
    f = (h0 @ p['w1'] + p['b1'][0]) @ p['w2'] + p['b2'][0]
    return ln(f + h0, p['g2'][0], p['be2'][0])


if __name__ == "__main__":
    # Small demo shapes for correctness only (D=32 is lane-sparse and grid=(2,1)
    # is overhead-dominated; do NOT use these shapes for benchmarking).
    L, B, D, H, F = 8, 2, 32, 4, 64   # seq, batch, model_dim, head_count, ffn_hidden

    key = jax.random.PRNGKey(0)
    kx, kp = jax.random.split(key)
    x = jax.random.normal(kx, (L, B, D), jnp.float32)   # mask=None case
    params = init_params(kp, D, H, F)

    ref = jax.block_until_ready(ref_transformer_encoder_block(x, params, H))

    # f32 MXU path: validated tightly against the pure-JAX reference.
    prep_f32 = prepare_params(params, H, matmul_dtype=jnp.float32)
    out_f32 = jax.block_until_ready(transformer_encoder_block(x, prep_f32, H))
    np.testing.assert_allclose(np.asarray(out_f32), np.asarray(ref),
                               rtol=2e-2, atol=2e-2)

    # bf16 MXU path (production default on v5e/v6e/v7x): sanity check that it
    # compiles and stays close to the f32 reference.
    prep_bf16 = prepare_params(params, H, matmul_dtype=jnp.bfloat16)
    out_bf16 = jax.block_until_ready(transformer_encoder_block(x, prep_bf16, H))
    max_err = float(jnp.max(jnp.abs(out_bf16.astype(jnp.float32) - ref)))
    assert max_err < 0.25, f"bf16 path sanity check failed: max abs err {max_err}"

    print("KERNEL_OK")
</pallas_src>

<mosaic_0001>
module attributes {stable_mosaic.version = 11 : i64} {
  func.func @_encoder_block_kernel(%arg0: i32, %arg1: i32, %arg2: memref<1x8x32xf32, #tpu.memory_space<vmem>>, %arg3: memref<1x8x32xf32, #tpu.memory_space<vmem>>, %arg4: memref<32x32xf32, #tpu.memory_space<vmem>>, %arg5: memref<1x32xf32, #tpu.memory_space<vmem>>, %arg6: memref<32x64xf32, #tpu.memory_space<vmem>>, %arg7: memref<1x64xf32, #tpu.memory_space<vmem>>, %arg8: memref<32x32xf32, #tpu.memory_space<vmem>>, %arg9: memref<1x32xf32, #tpu.memory_space<vmem>>, %arg10: memref<1x32xf32, #tpu.memory_space<vmem>>, %arg11: memref<1x32xf32, #tpu.memory_space<vmem>>, %arg12: memref<32x64xf32, #tpu.memory_space<vmem>>, %arg13: memref<1x64xf32, #tpu.memory_space<vmem>>, %arg14: memref<64x32xf32, #tpu.memory_space<vmem>>, %arg15: memref<1x32xf32, #tpu.memory_space<vmem>>, %arg16: memref<1x32xf32, #tpu.memory_space<vmem>>, %arg17: memref<1x32xf32, #tpu.memory_space<vmem>>, %arg18: memref<1x8x32xf32, #tpu.memory_space<vmem>>, %arg19: memref<8x32xf32, #tpu.memory_space<vmem>>) attributes {dimension_semantics = [#tpu.dimension_semantics<parallel>, #tpu.dimension_semantics<parallel>], iteration_bounds = array<i64: 2, 1>, scalar_prefetch = 0 : i64, scratch_operands = 1 : i64, tpu.core_type = #tpu.core_type<tc>, window_params = [{transform_indices = @transform_0, window_bounds = array<i64: 1, 8, 32>}, {transform_indices = @transform_1, window_bounds = array<i64: 1, 8, 32>}, {pipeline_mode = #tpu.pipeline_mode<synchronous>, transform_indices = @transform_2, window_bounds = array<i64: 32, 32>}, {pipeline_mode = #tpu.pipeline_mode<synchronous>, transform_indices = @transform_3, window_bounds = array<i64: 1, 32>}, {pipeline_mode = #tpu.pipeline_mode<synchronous>, transform_indices = @transform_4, window_bounds = array<i64: 32, 64>}, {pipeline_mode = #tpu.pipeline_mode<synchronous>, transform_indices = @transform_5, window_bounds = array<i64: 1, 64>}, {pipeline_mode = #tpu.pipeline_mode<synchronous>, transform_indices = @transform_6, window_bounds = array<i64: 32, 32>}, {pipeline_mode = #tpu.pipeline_mode<synchronous>, transform_indices = @transform_7, window_bounds = array<i64: 1, 32>}, {pipeline_mode = #tpu.pipeline_mode<synchronous>, transform_indices = @transform_8, window_bounds = array<i64: 1, 32>}, {pipeline_mode = #tpu.pipeline_mode<synchronous>, transform_indices = @transform_9, window_bounds = array<i64: 1, 32>}, {pipeline_mode = #tpu.pipeline_mode<synchronous>, transform_indices = @transform_10, window_bounds = array<i64: 32, 64>}, {pipeline_mode = #tpu.pipeline_mode<synchronous>, transform_indices = @transform_11, window_bounds = array<i64: 1, 64>}, {pipeline_mode = #tpu.pipeline_mode<synchronous>, transform_indices = @transform_12, window_bounds = array<i64: 64, 32>}, {pipeline_mode = #tpu.pipeline_mode<synchronous>, transform_indices = @transform_13, window_bounds = array<i64: 1, 32>}, {pipeline_mode = #tpu.pipeline_mode<synchronous>, transform_indices = @transform_14, window_bounds = array<i64: 1, 32>}, {pipeline_mode = #tpu.pipeline_mode<synchronous>, transform_indices = @transform_15, window_bounds = array<i64: 1, 32>}, {transform_indices = @transform_16, window_bounds = array<i64: 1, 8, 32>}]} {
    %c0 = arith.constant 0 : index
    %c0_0 = arith.constant 0 : index
    %c0_1 = arith.constant 0 : index
    %0 = vector.load %arg2[%c0, %c0_0, %c0_1] : memref<1x8x32xf32, #tpu.memory_space<vmem>>, vector<1x8x32xf32>
    %1 = vector.shape_cast %0 : vector<1x8x32xf32> to vector<8x32xf32>
    %c0_2 = arith.constant 0 : index
    %c0_3 = arith.constant 0 : index
    %c0_4 = arith.constant 0 : index
    %2 = vector.load %arg3[%c0_2, %c0_3, %c0_4] : memref<1x8x32xf32, #tpu.memory_space<vmem>>, vector<1x8x32xf32>
    %3 = vector.shape_cast %2 : vector<1x8x32xf32> to vector<8x32xf32>
    %c0_5 = arith.constant 0 : index
    %c0_6 = arith.constant 0 : index
    %4 = vector.load %arg4[%c0_5, %c0_6] : memref<32x32xf32, #tpu.memory_space<vmem>>, vector<32x32xf32>
    %cst = arith.constant dense<0.000000e+00> : vector<8x32xf32>
    %5 = tpu.matmul %1, %4, %cst {dimension_numbers = #tpu.dot_dimension_numbers<[1], [0], [0], [1], [0, 0, 1, 1], [], []>} : vector<8x32xf32>, vector<32x32xf32>, vector<8x32xf32> -> vector<8x32xf32>
    %c0_7 = arith.constant 0 : index
    %c0_8 = arith.constant 0 : index
    %6 = vector.load %arg5[%c0_7, %c0_8] : memref<1x32xf32, #tpu.memory_space<vmem>>, vector<1x32xf32>
    %7 = vector.broadcast %6 : vector<1x32xf32> to vector<8x32xf32>
    %8 = arith.addf %5, %7 : vector<8x32xf32>
    %c0_9 = arith.constant 0 : index
    %c0_10 = arith.constant 0 : index
    %9 = vector.load %arg6[%c0_9, %c0_10] : memref<32x64xf32, #tpu.memory_space<vmem>>, vector<32x64xf32>
    %cst_11 = arith.constant dense<0.000000e+00> : vector<8x64xf32>
    %10 = tpu.matmul %3, %9, %cst_11 {dimension_numbers = #tpu.dot_dimension_numbers<[1], [0], [0], [1], [0, 0, 1, 1], [], []>} : vector<8x32xf32>, vector<32x64xf32>, vector<8x64xf32> -> vector<8x64xf32>
    %c0_12 = arith.constant 0 : index
    %c0_13 = arith.constant 0 : index
    %11 = vector.load %arg7[%c0_12, %c0_13] : memref<1x64xf32, #tpu.memory_space<vmem>>, vector<1x64xf32>
    %12 = vector.broadcast %11 : vector<1x64xf32> to vector<8x64xf32>
    %13 = arith.addf %10, %12 : vector<8x64xf32>
    %14 = vector.extract_strided_slice %8 {offsets = [0, 0], sizes = [8, 8], strides = [1, 1]} : vector<8x32xf32> to vector<8x8xf32>
    %15 = vector.extract_strided_slice %13 {offsets = [0, 0], sizes = [8, 8], strides = [1, 1]} : vector<8x64xf32> to vector<8x8xf32>
    %16 = vector.extract_strided_slice %13 {offsets = [0, 32], sizes = [8, 8], strides = [1, 1]} : vector<8x64xf32> to vector<8x8xf32>
    %cst_14 = arith.constant dense<0.000000e+00> : vector<8x8xf32>
    %17 = tpu.matmul %14, %15, %cst_14 {dimension_numbers = #tpu.dot_dimension_numbers<[1], [1], [0], [0], [0, 0, 1, 0], [], []>} : vector<8x8xf32>, vector<8x8xf32>, vector<8x8xf32> -> vector<8x8xf32>
    %cst_15 = arith.constant dense<0xFF800000> : vector<8xf32>
    %18 = vector.multi_reduction <maximumf>, %17, %cst_15 [1] : vector<8x8xf32> to vector<8xf32>
    %19 = vector.shape_cast %18 : vector<8xf32> to vector<8x1xf32>
    %20 = vector.broadcast %19 : vector<8x1xf32> to vector<8x8xf32>
    %21 = arith.subf %17, %20 : vector<8x8xf32>
    %22 = math.exp %21 : vector<8x8xf32>
    %cst_16 = arith.constant dense<0.000000e+00> : vector<8xf32>
    %23 = vector.multi_reduction <add>, %22, %cst_16 [1] : vector<8x8xf32> to vector<8xf32>
    %24 = vector.shape_cast %23 : vector<8xf32> to vector<8x1xf32>
    %25 = tpu.reciprocal %24 {approx = true} : vector<8x1xf32> -> vector<8x1xf32>
    %26 = vector.broadcast %25 : vector<8x1xf32> to vector<8x8xf32>
    %27 = arith.mulf %22, %26 : vector<8x8xf32>
    %cst_17 = arith.constant dense<0.000000e+00> : vector<8x8xf32>
    %28 = tpu.matmul %27, %16, %cst_17 {dimension_numbers = #tpu.dot_dimension_numbers<[1], [0], [0], [1], [0, 0, 1, 1], [], []>} : vector<8x8xf32>, vector<8x8xf32>, vector<8x8xf32> -> vector<8x8xf32>
    %c0_18 = arith.constant 0 : index
    %c0_19 = arith.constant 0 : index
    %29 = vector.load %arg19[%c0_18, %c0_19] : memref<8x32xf32, #tpu.memory_space<vmem>>, vector<8x8xf32>
    tpu.vector_store %arg19[%c0_18, %c0_19], %28 {strides = array<i32>} : memref<8x32xf32, #tpu.memory_space<vmem>>, vector<8x8xf32>,
    %30 = vector.extract_strided_slice %8 {offsets = [0, 8], sizes = [8, 8], strides = [1, 1]} : vector<8x32xf32> to vector<8x8xf32>
    %31 = vector.extract_strided_slice %13 {offsets = [0, 8], sizes = [8, 8], strides = [1, 1]} : vector<8x64xf32> to vector<8x8xf32>
    %32 = vector.extract_strided_slice %13 {offsets = [0, 40], sizes = [8, 8], strides = [1, 1]} : vector<8x64xf32> to vector<8x8xf32>
    %cst_20 = arith.constant dense<0.000000e+00> : vector<8x8xf32>
    %33 = tpu.matmul %30, %31, %cst_20 {dimension_numbers = #tpu.dot_dimension_numbers<[1], [1], [0], [0], [0, 0, 1, 0], [], []>} : vector<8x8xf32>, vector<8x8xf32>, vector<8x8xf32> -> vector<8x8xf32>
    %cst_21 = arith.constant dense<0xFF800000> : vector<8xf32>
    %34 = vector.multi_reduction <maximumf>, %33, %cst_21 [1] : vector<8x8xf32> to vector<8xf32>
    %35 = vector.shape_cast %34 : vector<8xf32> to vector<8x1xf32>
    %36 = vector.broadcast %35 : vector<8x1xf32> to vector<8x8xf32>
    %37 = arith.subf %33, %36 : vector<8x8xf32>
    %38 = math.exp %37 : vector<8x8xf32>
    %cst_22 = arith.constant dense<0.000000e+00> : vector<8xf32>
    %39 = vector.multi_reduction <add>, %38, %cst_22 [1] : vector<8x8xf32> to vector<8xf32>
    %40 = vector.shape_cast %39 : vector<8xf32> to vector<8x1xf32>
    %41 = tpu.reciprocal %40 {approx = true} : vector<8x1xf32> -> vector<8x1xf32>
    %42 = vector.broadcast %41 : vector<8x1xf32> to vector<8x8xf32>
    %43 = arith.mulf %38, %42 : vector<8x8xf32>
    %cst_23 = arith.constant dense<0.000000e+00> : vector<8x8xf32>
    %44 = tpu.matmul %43, %32, %cst_23 {dimension_numbers = #tpu.dot_dimension_numbers<[1], [0], [0], [1], [0, 0, 1, 1], [], []>} : vector<8x8xf32>, vector<8x8xf32>, vector<8x8xf32> -> vector<8x8xf32>
    %c0_24 = arith.constant 0 : index
    %c8 = arith.constant 8 : index
    %45 = vector.load %arg19[%c0_24, %c8] : memref<8x32xf32, #tpu.memory_space<vmem>>, vector<8x8xf32>
    tpu.vector_store %arg19[%c0_24, %c8], %44 {strides = array<i32>} : memref<8x32xf32, #tpu.memory_space<vmem>>, vector<8x8xf32>,
    %46 = vector.extract_strided_slice %8 {offsets = [0, 16], sizes = [8, 8], strides = [1, 1]} : vector<8x32xf32> to vector<8x8xf32>
    %47 = vector.extract_strided_slice %13 {offsets = [0, 16], sizes = [8, 8], strides = [1, 1]} : vector<8x64xf32> to vector<8x8xf32>
    %48 = vector.extract_strided_slice %13 {offsets = [0, 48], sizes = [8, 8], strides = [1, 1]} : vector<8x64xf32> to vector<8x8xf32>
    %cst_25 = arith.constant dense<0.000000e+00> : vector<8x8xf32>
    %49 = tpu.matmul %46, %47, %cst_25 {dimension_numbers = #tpu.dot_dimension_numbers<[1], [1], [0], [0], [0, 0, 1, 0], [], []>} : vector<8x8xf32>, vector<8x8xf32>, vector<8x8xf32> -> vector<8x8xf32>
    %cst_26 = arith.constant dense<0xFF800000> : vector<8xf32>
    %50 = vector.multi_reduction <maximumf>, %49, %cst_26 [1] : vector<8x8xf32> to vector<8xf32>
    %51 = vector.shape_cast %50 : vector<8xf32> to vector<8x1xf32>
    %52 = vector.broadcast %51 : vector<8x1xf32> to vector<8x8xf32>
    %53 = arith.subf %49, %52 : vector<8x8xf32>
    %54 = math.exp %53 : vector<8x8xf32>
    %cst_27 = arith.constant dense<0.000000e+00> : vector<8xf32>
    %55 = vector.multi_reduction <add>, %54, %cst_27 [1] : vector<8x8xf32> to vector<8xf32>
    %56 = vector.shape_cast %55 : vector<8xf32> to vector<8x1xf32>
    %57 = tpu.reciprocal %56 {approx = true} : vector<8x1xf32> -> vector<8x1xf32>
    %58 = vector.broadcast %57 : vector<8x1xf32> to vector<8x8xf32>
    %59 = arith.mulf %54, %58 : vector<8x8xf32>
    %cst_28 = arith.constant dense<0.000000e+00> : vector<8x8xf32>
    %60 = tpu.matmul %59, %48, %cst_28 {dimension_numbers = #tpu.dot_dimension_numbers<[1], [0], [0], [1], [0, 0, 1, 1], [], []>} : vector<8x8xf32>, vector<8x8xf32>, vector<8x8xf32> -> vector<8x8xf32>
    %c0_29 = arith.constant 0 : index
    %c16 = arith.constant 16 : index
    %61 = vector.load %arg19[%c0_29, %c16] : memref<8x32xf32, #tpu.memory_space<vmem>>, vector<8x8xf32>
    tpu.vector_store %arg19[%c0_29, %c16], %60 {strides = array<i32>} : memref<8x32xf32, #tpu.memory_space<vmem>>, vector<8x8xf32>,
    %62 = vector.extract_strided_slice %8 {offsets = [0, 24], sizes = [8, 8], strides = [1, 1]} : vector<8x32xf32> to vector<8x8xf32>
    %63 = vector.extract_strided_slice %13 {offsets = [0, 24], sizes = [8, 8], strides = [1, 1]} : vector<8x64xf32> to vector<8x8xf32>
    %64 = vector.extract_strided_slice %13 {offsets = [0, 56], sizes = [8, 8], strides = [1, 1]} : vector<8x64xf32> to vector<8x8xf32>
    %cst_30 = arith.constant dense<0.000000e+00> : vector<8x8xf32>
    %65 = tpu.matmul %62, %63, %cst_30 {dimension_numbers = #tpu.dot_dimension_numbers<[1], [1], [0], [0], [0, 0, 1, 0], [], []>} : vector<8x8xf32>, vector<8x8xf32>, vector<8x8xf32> -> vector<8x8xf32>
    %cst_31 = arith.constant dense<0xFF800000> : vector<8xf32>
    %66 = vector.multi_reduction <maximumf>, %65, %cst_31 [1] : vector<8x8xf32> to vector<8xf32>
    %67 = vector.shape_cast %66 : vector<8xf32> to vector<8x1xf32>
    %68 = vector.broadcast %67 : vector<8x1xf32> to vector<8x8xf32>
    %69 = arith.subf %65, %68 : vector<8x8xf32>
    %70 = math.exp %69 : vector<8x8xf32>
    %cst_32 = arith.constant dense<0.000000e+00> : vector<8xf32>
    %71 = vector.multi_reduction <add>, %70, %cst_32 [1] : vector<8x8xf32> to vector<8xf32>
    %72 = vector.shape_cast %71 : vector<8xf32> to vector<8x1xf32>
    %73 = tpu.reciprocal %72 {approx = true} : vector<8x1xf32> -> vector<8x1xf32>
    %74 = vector.broadcast %73 : vector<8x1xf32> to vector<8x8xf32>
    %75 = arith.mulf %70, %74 : vector<8x8xf32>
    %cst_33 = arith.constant dense<0.000000e+00> : vector<8x8xf32>
    %76 = tpu.matmul %75, %64, %cst_33 {dimension_numbers = #tpu.dot_dimension_numbers<[1], [0], [0], [1], [0, 0, 1, 1], [], []>} : vector<8x8xf32>, vector<8x8xf32>, vector<8x8xf32> -> vector<8x8xf32>
    %c0_34 = arith.constant 0 : index
    %c24 = arith.constant 24 : index
    %77 = vector.load %arg19[%c0_34, %c24] : memref<8x32xf32, #tpu.memory_space<vmem>>, vector<8x8xf32>
    tpu.vector_store %arg19[%c0_34, %c24], %76 {strides = array<i32>} : memref<8x32xf32, #tpu.memory_space<vmem>>, vector<8x8xf32>,
    %c0_35 = arith.constant 0 : index
    %c0_36 = arith.constant 0 : index
    %78 = vector.load %arg19[%c0_35, %c0_36] : memref<8x32xf32, #tpu.memory_space<vmem>>, vector<8x32xf32>
    %c0_37 = arith.constant 0 : index
    %c0_38 = arith.constant 0 : index
    %79 = vector.load %arg8[%c0_37, %c0_38] : memref<32x32xf32, #tpu.memory_space<vmem>>, vector<32x32xf32>
    %cst_39 = arith.constant dense<0.000000e+00> : vector<8x32xf32>
    %80 = tpu.matmul %78, %79, %cst_39 {dimension_numbers = #tpu.dot_dimension_numbers<[1], [0], [0], [1], [0, 0, 1, 1], [], []>} : vector<8x32xf32>, vector<32x32xf32>, vector<8x32xf32> -> vector<8x32xf32>
    %c0_40 = arith.constant 0 : index
    %c0_41 = arith.constant 0 : index
    %81 = vector.load %arg9[%c0_40, %c0_41] : memref<1x32xf32, #tpu.memory_space<vmem>>, vector<1x32xf32>
    %82 = vector.broadcast %81 : vector<1x32xf32> to vector<8x32xf32>
    %83 = arith.addf %80, %82 : vector<8x32xf32>
    %84 = arith.addf %83, %1 : vector<8x32xf32>
    %cst_42 = arith.constant dense<0.000000e+00> : vector<8xf32>
    %85 = vector.multi_reduction <add>, %84, %cst_42 [1] : vector<8x32xf32> to vector<8xf32>
    %86 = vector.shape_cast %85 : vector<8xf32> to vector<8x1xf32>
    %cst_43 = arith.constant 3.200000e+01 : f32
    %87 = vector.broadcast %cst_43 : f32 to vector<8x1xf32>
    %88 = arith.divf %86, %87 : vector<8x1xf32>
    %89 = vector.broadcast %88 : vector<8x1xf32> to vector<8x32xf32>
    %90 = arith.subf %84, %89 : vector<8x32xf32>
    %91 = arith.mulf %90, %90 : vector<8x32xf32>
    %cst_44 = arith.constant dense<0.000000e+00> : vector<8xf32>
    %92 = vector.multi_reduction <add>, %91, %cst_44 [1] : vector<8x32xf32> to vector<8xf32>
    %93 = vector.shape_cast %92 : vector<8xf32> to vector<8x1xf32>
    %cst_45 = arith.constant 3.200000e+01 : f32
    %94 = vector.broadcast %cst_45 : f32 to vector<8x1xf32>
    %95 = arith.divf %93, %94 : vector<8x1xf32>
    %96 = vector.broadcast %88 : vector<8x1xf32> to vector<8x32xf32>
    %97 = arith.subf %84, %96 : vector<8x32xf32>
    %cst_46 = arith.constant 9.99999974E-6 : f32
    %98 = vector.broadcast %cst_46 : f32 to vector<8x1xf32>
    %99 = arith.addf %95, %98 : vector<8x1xf32>
    %100 = math.rsqrt %99 : vector<8x1xf32>
    %101 = vector.broadcast %100 : vector<8x1xf32> to vector<8x32xf32>
    %102 = arith.mulf %97, %101 : vector<8x32xf32>
    %c0_47 = arith.constant 0 : index
    %c0_48 = arith.constant 0 : index
    %103 = vector.load %arg10[%c0_47, %c0_48] : memref<1x32xf32, #tpu.memory_space<vmem>>, vector<1x32xf32>
    %104 = vector.broadcast %103 : vector<1x32xf32> to vector<8x32xf32>
    %105 = arith.mulf %102, %104 : vector<8x32xf32>
    %c0_49 = arith.constant 0 : index
    %c0_50 = arith.constant 0 : index
    %106 = vector.load %arg11[%c0_49, %c0_50] : memref<1x32xf32, #tpu.memory_space<vmem>>, vector<1x32xf32>
    %107 = vector.broadcast %106 : vector<1x32xf32> to vector<8x32xf32>
    %108 = arith.addf %105, %107 : vector<8x32xf32>
    %c0_51 = arith.constant 0 : index
    %c0_52 = arith.constant 0 : index
    %109 = vector.load %arg12[%c0_51, %c0_52] : memref<32x64xf32, #tpu.memory_space<vmem>>, vector<32x64xf32>
    %cst_53 = arith.constant dense<0.000000e+00> : vector<8x64xf32>
    %110 = tpu.matmul %108, %109, %cst_53 {dimension_numbers = #tpu.dot_dimension_numbers<[1], [0], [0], [1], [0, 0, 1, 1], [], []>} : vector<8x32xf32>, vector<32x64xf32>, vector<8x64xf32> -> vector<8x64xf32>
    %c0_54 = arith.constant 0 : index
    %c0_55 = arith.constant 0 : index
    %111 = vector.load %arg13[%c0_54, %c0_55] : memref<1x64xf32, #tpu.memory_space<vmem>>, vector<1x64xf32>
    %112 = vector.broadcast %111 : vector<1x64xf32> to vector<8x64xf32>
    %113 = arith.addf %110, %112 : vector<8x64xf32>
    %c0_56 = arith.constant 0 : index
    %c0_57 = arith.constant 0 : index
    %114 = vector.load %arg14[%c0_56, %c0_57] : memref<64x32xf32, #tpu.memory_space<vmem>>, vector<64x32xf32>
    %cst_58 = arith.constant dense<0.000000e+00> : vector<8x32xf32>
    %115 = tpu.matmul %113, %114, %cst_58 {dimension_numbers = #tpu.dot_dimension_numbers<[1], [0], [0], [1], [0, 0, 1, 1], [], []>} : vector<8x64xf32>, vector<64x32xf32>, vector<8x32xf32> -> vector<8x32xf32>
    %c0_59 = arith.constant 0 : index
    %c0_60 = arith.constant 0 : index
    %116 = vector.load %arg15[%c0_59, %c0_60] : memref<1x32xf32, #tpu.memory_space<vmem>>, vector<1x32xf32>
    %117 = vector.broadcast %116 : vector<1x32xf32> to vector<8x32xf32>
    %118 = arith.addf %115, %117 : vector<8x32xf32>
    %119 = arith.addf %118, %108 : vector<8x32xf32>
    %cst_61 = arith.constant dense<0.000000e+00> : vector<8xf32>
    %120 = vector.multi_reduction <add>, %119, %cst_61 [1] : vector<8x32xf32> to vector<8xf32>
    %121 = vector.shape_cast %120 : vector<8xf32> to vector<8x1xf32>
    %cst_62 = arith.constant 3.200000e+01 : f32
    %122 = vector.broadcast %cst_62 : f32 to vector<8x1xf32>
    %123 = arith.divf %121, %122 : vector<8x1xf32>
    %124 = vector.broadcast %123 : vector<8x1xf32> to vector<8x32xf32>
    %125 = arith.subf %119, %124 : vector<8x32xf32>
    %126 = arith.mulf %125, %125 : vector<8x32xf32>
    %cst_63 = arith.constant dense<0.000000e+00> : vector<8xf32>
    %127 = vector.multi_reduction <add>, %126, %cst_63 [1] : vector<8x32xf32> to vector<8xf32>
    %128 = vector.shape_cast %127 : vector<8xf32> to vector<8x1xf32>
    %cst_64 = arith.constant 3.200000e+01 : f32
    %129 = vector.broadcast %cst_64 : f32 to vector<8x1xf32>
    %130 = arith.divf %128, %129 : vector<8x1xf32>
    %131 = vector.broadcast %123 : vector<8x1xf32> to vector<8x32xf32>
    %132 = arith.subf %119, %131 : vector<8x32xf32>
    %cst_65 = arith.constant 9.99999974E-6 : f32
    %133 = vector.broadcast %cst_65 : f32 to vector<8x1xf32>
    %134 = arith.addf %130, %133 : vector<8x1xf32>
    %135 = math.rsqrt %134 : vector<8x1xf32>
    %136 = vector.broadcast %135 : vector<8x1xf32> to vector<8x32xf32>
    %137 = arith.mulf %132, %136 : vector<8x32xf32>
    %c0_66 = arith.constant 0 : index
    %c0_67 = arith.constant 0 : index
    %138 = vector.load %arg16[%c0_66, %c0_67] : memref<1x32xf32, #tpu.memory_space<vmem>>, vector<1x32xf32>
    %139 = vector.broadcast %138 : vector<1x32xf32> to vector<8x32xf32>
    %140 = arith.mulf %137, %139 : vector<8x32xf32>
    %c0_68 = arith.constant 0 : index
    %c0_69 = arith.constant 0 : index
    %141 = vector.load %arg17[%c0_68, %c0_69] : memref<1x32xf32, #tpu.memory_space<vmem>>, vector<1x32xf32>
    %142 = vector.broadcast %141 : vector<1x32xf32> to vector<8x32xf32>
    %143 = arith.addf %140, %142 : vector<8x32xf32>
    %c0_70 = arith.constant 0 : index
    %c0_71 = arith.constant 0 : index
    %c0_72 = arith.constant 0 : index
    %144 = vector.load %arg18[%c0_70, %c0_71, %c0_72] : memref<1x8x32xf32, #tpu.memory_space<vmem>>, vector<1x8x32xf32>
    %145 = vector.shape_cast %144 : vector<1x8x32xf32> to vector<8x32xf32>
    %146 = vector.shape_cast %143 : vector<8x32xf32> to vector<1x8x32xf32>
    tpu.vector_store %arg18[%c0_70, %c0_71, %c0_72], %146 {strides = array<i32>} : memref<1x8x32xf32, #tpu.memory_space<vmem>>, vector<1x8x32xf32>,
    return
  }
  func.func @transform_0(%arg0: i32, %arg1: i32) -> (i32, i32, i32) {
    %c0_i32 = arith.constant 0 : i32
    %c0_i32_0 = arith.constant 0 : i32
    return %arg0, %arg1, %c0_i32 : i32, i32, i32
  }
  func.func @transform_1(%arg0: i32, %arg1: i32) -> (i32, i32, i32) {
    %c0_i32 = arith.constant 0 : i32
    %c0_i32_0 = arith.constant 0 : i32
    %c0_i32_1 = arith.constant 0 : i32
    return %arg0, %c0_i32, %c0_i32_0 : i32, i32, i32
  }
  func.func @transform_2(%arg0: i32, %arg1: i32) -> (i32, i32) {
    %c0_i32 = arith.constant 0 : i32
    %c0_i32_0 = arith.constant 0 : i32
    %c0_i32_1 = arith.constant 0 : i32
    return %c0_i32, %c0_i32_0 : i32, i32
  }
  func.func @transform_3(%arg0: i32, %arg1: i32) -> (i32, i32) {
    %c0_i32 = arith.constant 0 : i32
    %c0_i32_0 = arith.constant 0 : i32
    %c0_i32_1 = arith.constant 0 : i32
    return %c0_i32, %c0_i32_0 : i32, i32
  }
  func.func @transform_4(%arg0: i32, %arg1: i32) -> (i32, i32) {
    %c0_i32 = arith.constant 0 : i32
    %c0_i32_0 = arith.constant 0 : i32
    %c0_i32_1 = arith.constant 0 : i32
    return %c0_i32, %c0_i32_0 : i32, i32
  }
  func.func @transform_5(%arg0: i32, %arg1: i32) -> (i32, i32) {
    %c0_i32 = arith.constant 0 : i32
    %c0_i32_0 = arith.constant 0 : i32
    %c0_i32_1 = arith.constant 0 : i32
    return %c0_i32, %c0_i32_0 : i32, i32
  }
  func.func @transform_6(%arg0: i32, %arg1: i32) -> (i32, i32) {
    %c0_i32 = arith.constant 0 : i32
    %c0_i32_0 = arith.constant 0 : i32
    %c0_i32_1 = arith.constant 0 : i32
    return %c0_i32, %c0_i32_0 : i32, i32
  }
  func.func @transform_7(%arg0: i32, %arg1: i32) -> (i32, i32) {
    %c0_i32 = arith.constant 0 : i32
    %c0_i32_0 = arith.constant 0 : i32
    %c0_i32_1 = arith.constant 0 : i32
    return %c0_i32, %c0_i32_0 : i32, i32
  }
  func.func @transform_8(%arg0: i32, %arg1: i32) -> (i32, i32) {
    %c0_i32 = arith.constant 0 : i32
    %c0_i32_0 = arith.constant 0 : i32
    %c0_i32_1 = arith.constant 0 : i32
    return %c0_i32, %c0_i32_0 : i32, i32
  }
  func.func @transform_9(%arg0: i32, %arg1: i32) -> (i32, i32) {
    %c0_i32 = arith.constant 0 : i32
    %c0_i32_0 = arith.constant 0 : i32
    %c0_i32_1 = arith.constant 0 : i32
    return %c0_i32, %c0_i32_0 : i32, i32
  }
  func.func @transform_10(%arg0: i32, %arg1: i32) -> (i32, i32) {
    %c0_i32 = arith.constant 0 : i32
    %c0_i32_0 = arith.constant 0 : i32
    %c0_i32_1 = arith.constant 0 : i32
    return %c0_i32, %c0_i32_0 : i32, i32
  }
  func.func @transform_11(%arg0: i32, %arg1: i32) -> (i32, i32) {
    %c0_i32 = arith.constant 0 : i32
    %c0_i32_0 = arith.constant 0 : i32
    %c0_i32_1 = arith.constant 0 : i32
    return %c0_i32, %c0_i32_0 : i32, i32
  }
  func.func @transform_12(%arg0: i32, %arg1: i32) -> (i32, i32) {
    %c0_i32 = arith.constant 0 : i32
    %c0_i32_0 = arith.constant 0 : i32
    %c0_i32_1 = arith.constant 0 : i32
    return %c0_i32, %c0_i32_0 : i32, i32
  }
  func.func @transform_13(%arg0: i32, %arg1: i32) -> (i32, i32) {
    %c0_i32 = arith.constant 0 : i32
    %c0_i32_0 = arith.constant 0 : i32
    %c0_i32_1 = arith.constant 0 : i32
    return %c0_i32, %c0_i32_0 : i32, i32
  }
  func.func @transform_14(%arg0: i32, %arg1: i32) -> (i32, i32) {
    %c0_i32 = arith.constant 0 : i32
    %c0_i32_0 = arith.constant 0 : i32
    %c0_i32_1 = arith.constant 0 : i32
    return %c0_i32, %c0_i32_0 : i32, i32
  }
  func.func @transform_15(%arg0: i32, %arg1: i32) -> (i32, i32) {
    %c0_i32 = arith.constant 0 : i32
    %c0_i32_0 = arith.constant 0 : i32
    %c0_i32_1 = arith.constant 0 : i32
    return %c0_i32, %c0_i32_0 : i32, i32
  }
  func.func @transform_16(%arg0: i32, %arg1: i32) -> (i32, i32, i32) {
    %c0_i32 = arith.constant 0 : i32
    %c0_i32_0 = arith.constant 0 : i32
    return %arg0, %arg1, %c0_i32 : i32, i32, i32
  }
}

</mosaic_0001>

<bundles_post_ra>
// kernel: transformer_encoder_block.1
= control target key start
LH: loop header
LB: loop body
LE: loop exit
PB: predicated region body
PF: predicated region fallthrough
CT: control target
= control target key end

     0   :  { %s3077_s0 = inlined_call_operand.vmem [shape: f32[2,8,32], index: 0, kind: input, shape index: {}, may-alias: {0,1}]   ;;  %s3078_s1 = inlined_call_operand.vmem [shape: f32[2,8,32], index: 1, kind: input, shape index: {}, may-alias: {0,1}]   ;;  %s3079_s2 = inlined_call_operand.vmem [shape: f32[32,32], index: 2, kind: input, shape index: {}]   ;;  %s3080_s3 = inlined_call_operand.vmem [shape: f32[1,32], index: 3, kind: input, shape index: {}]   ;;  %s3081_s4 = inlined_call_operand.vmem [shape: f32[32,64], index: 4, kind: input, shape index: {}]   ;;  %s3082_s5 = inlined_call_operand.vmem [shape: f32[1,64], index: 5, kind: input, shape index: {}]   ;;  %s3083_s6 = inlined_call_operand.vmem [shape: f32[32,32], index: 6, kind: input, shape index: {}]   ;;  %s3084_s7 = inlined_call_operand.hbm [shape: f32[1,32], index: 7, kind: input, shape index: {}]   ;;  %s3085_s8 = inlined_call_operand.hbm [shape: f32[1,32], index: 8, kind: input, shape index: {}]   ;;  %s3086_s9 = inlined_call_operand.hbm [shape: f32[1,32], index: 9, kind: input, shape index: {}]   ;;  %s3087_s10 = inlined_call_operand.vmem [shape: f32[32,64], index: 10, kind: input, shape index: {}]   ;;  %s3088_s11 = inlined_call_operand.hbm [shape: f32[1,64], index: 11, kind: input, shape index: {}]   ;;  %s3089_s12 = inlined_call_operand.vmem [shape: f32[64,32], index: 12, kind: input, shape index: {}]   ;;  %s3090_s13 = inlined_call_operand.hbm [shape: f32[1,32], index: 13, kind: input, shape index: {}]   ;;  %s3091_s14 = inlined_call_operand.hbm [shape: f32[1,32], index: 14, kind: input, shape index: {}]   ;;  %s3092_s15 = inlined_call_operand.hbm [shape: f32[1,32], index: 15, kind: input, shape index: {}]   ;;  %s3093_s16 = inlined_call_operand.vmem [shape: f32[2,8,32], index: 16, kind: output, shape index: {}]  }
   0x1   :  { %3100 = sst [smem:[#allocation19_spill]] %s3077_s0 }
   0x2   :  { %3101 = sst [smem:[#allocation20_spill]] %s3085_s8 }
   0x3   :  { %3102 = sst [smem:[#allocation21_spill]] %s3087_s10 }
   0x4   :  { %3103 = sst [smem:[#allocation22_spill]] %s3088_s11 }
   0x5   :  { %3104 = sst [smem:[#allocation23_spill]] %s3089_s12 }
   0x6   :  { %3105 = sst [smem:[#allocation24_spill]] %s3093_s16 }
   0x7   :  { %21 = vsyncpa [#allocation4], 0 }
   0x8   :  { %22 = vsyncpa [#allocation6], 0 }
   0x9   :  { %23 = vsyncpa [#allocation9], 0 }
   0xa   :  { %24 = vsyncpa [#allocation12], 0  ;;  %s2681_s21 = smov 0   ;;  %s2683_s22 = smov 0  }
   0xb   :  { %s2685_s23 = smov 0  }
   0xc LB: > { %3106 = sst [smem:[#allocation18_spill]] %s2574_s23  ;;  %s2576_s24 = smov [#allocation5]   ;;  %s2574_s23 = sphi %s2685_s23, %s30_s23   ;;  %s2570_s22 = sphi %s2683_s22, %s3121_s22   ;;  %s2566_s21 = sphi %s2681_s21, %s3120_s21  }
   0xd   : > { %s462_s25 = sshll.u32 %s2576_s24, 4  ;;  %s1978_s26 = sadd.s32 4294967295, %s2574_s23   ;;  %s463_s25 = int_to_ptr.vmem [resolvable:$true] %s462_s25 }
   0xe   : > { %p1980_p0 = scmp.ge.s32.totalorder %s2574_s23, 1  ;;  %p423_p1 = scmp.lt.s32.totalorder %s2574_s23, 3 }
   0xf   : > { %p2699_p2 = scmp.eq.s32.totalorder %s1978_s26, 0  ;;  %s2577_s29 = smov [#allocation8]  }
  0x10   : > { %p2703_p3 = pnand %p1980_p0, %p423_p1  ;;  %s487_s30 = sshll.u32 %s2577_s29, 4  ;;  %s2709_s30 = int_to_ptr.vmem [resolvable:$true] %s487_s30 }
  0x11   : > { %s3107_s27 = scalar_select %p2699_p2, 1, 0 }
  0x12   : > { %s3108_s28 = scalar_select %p2703_p3, 1, 0 }
  0x13   : > { %p2240_p4 = pneg %p2703_p3  ;;  %s2578_s0 = smov [#allocation11]  }
  0x14   : > { %s512_s17 = sshll.u32 %s2578_s0, 4  ;;  %s3110_s8 = sld [smem:[#allocation20_spill]]  ;;  %s2717_s17 = int_to_ptr.vmem [resolvable:$true] %s512_s17 }
  0x15   : > { %p2713_p5 = pnand %p2699_p2, %p2240_p4 }
  0x17   : > { %p2727_p7 = pneg %p2713_p5 }
  0x1a   : > { %s2340_s24 = scalar_lea.hbm %s3110_s8, 16 }
  0x1b   : > { %p2341_p6 = scmp.ne.s32.totalorder %s3110_s8, %s2340_s24  ;;  %p2347_p10 = scmp.lt.u32.totalorder %s2340_s24, %s3110_s8 }
  0x1d   : > { %p2343_p8 = pnand %p2727_p7, %p2341_p6 }
  0x1f   : > { %p2344_p9 = pneg %p2343_p8 }
  0x21   : > { %p2349_p11 = pnand %p2347_p10, %p2344_p9 }
  0x23   : > { %2352 = shalt.err (!%p2349_p11)
}
  0x24   : > { %s2353_s19 = scalar_lea.vmem %s463_s25, 16  ;;  %s2360_s20 = scalar_lea.vmem %s463_s25, 32 }
  0x25   : > { %p2354_p12 = scmp.ne.s32.totalorder %s463_s25, %s2353_s19  ;;  %p2361_p1 = scmp.lt.s32.totalorder %s463_s25, %s463_s25 }
  0x26   : > { %p2362_p4 = scmp.lt.s32.totalorder %s2360_s20, %s2353_s19 }
  0x27   : > { %p2356_p13 = pnand %p2354_p12, %p2727_p7 }
  0x28   : > { %p2363_p2 = por %p2362_p4, %p2361_p1 }
  0x29   : > { %p2357_p0 = pneg %p2356_p13 }
  0x2b   : > { %p2364_p3 = pnand %p2363_p2, %p2357_p0 }
  0x2d   : > { %2367 = shalt.err (!%p2364_p3)
}
  0x2e   : > { %2246 = dma.hbm_to_vmem [thread:$0]  (!%p2713_p5), %s3110_s8, 16, %s463_s25, [#allocation6]  }
  0x2f   : > { %s3112_s11 = sld [smem:[#allocation22_spill]] }
  0x35   : > { %s2368_s0 = scalar_lea.hbm %s3112_s11, 16 }
  0x36   : > { %p2369_p6 = scmp.ne.s32.totalorder %s3112_s11, %s2368_s0  ;;  %p2375_p2 = scmp.lt.u32.totalorder %s2368_s0, %s3112_s11 }
  0x38   : > { %p2371_p8 = pnand %p2369_p6, %p2727_p7 }
  0x3a   : > { %p2372_p9 = pneg %p2371_p8 }
  0x3c   : > { %p2377_p3 = pnand %p2375_p2, %p2372_p9 }
  0x3e   : > { %2380 = shalt.err (!%p2377_p3)
}
  0x3f   : > { %s2381_s25 = scalar_lea.vmem %s2709_s30, 16  ;;  %s2388_s10 = scalar_lea.vmem %s2709_s30, 32 }
  0x40   : > { %p2382_p10 = scmp.ne.s32.totalorder %s2709_s30, %s2381_s25  ;;  %p2389_p13 = scmp.lt.s32.totalorder %s2709_s30, %s2709_s30 }
  0x41   : > { %p2390_p0 = scmp.lt.s32.totalorder %s2388_s10, %s2381_s25 }
  0x42   : > { %p2384_p11 = pnand %p2382_p10, %p2727_p7 }
  0x43   : > { %p2391_p1 = por %p2390_p0, %p2389_p13 }
  0x44   : > { %p2385_p12 = pneg %p2384_p11 }
  0x46   : > { %p2392_p4 = pnand %p2391_p1, %p2385_p12 }
  0x48   : > { %2395 = shalt.err (!%p2392_p4)
}
  0x49   : > { %2252 = dma.hbm_to_vmem [thread:$0]  (!%p2713_p5), %s3112_s11, 16, %s2709_s30, [#allocation9]  }
  0x4a   : > { %s2396_s24 = scalar_lea.hbm %s3091_s14, 16 }
  0x4b   : > { %p2397_p6 = scmp.ne.s32.totalorder %s3091_s14, %s2396_s24  ;;  %p2403_p2 = scmp.lt.u32.totalorder %s2396_s24, %s3091_s14 }
  0x4d   : > { %p2399_p8 = pnand %p2397_p6, %p2727_p7 }
  0x4f   : > { %p2400_p9 = pneg %p2399_p8 }
  0x51   : > { %p2405_p3 = pnand %p2403_p2, %p2400_p9 }
  0x53   : > { %2408 = shalt.err (!%p2405_p3)
}
  0x54   : > { %s2409_s30 = scalar_lea.vmem %s2717_s17, 16  ;;  %s2416_s10 = scalar_lea.vmem %s2717_s17, 32 }
  0x55   : > { %p2410_p10 = scmp.ne.s32.totalorder %s2717_s17, %s2409_s30  ;;  %p2417_p13 = scmp.lt.s32.totalorder %s2717_s17, %s2717_s17 }
  0x56   : > { %p2418_p0 = scmp.lt.s32.totalorder %s2416_s10, %s2409_s30 }
  0x57   : > { %p2412_p11 = pnand %p2410_p10, %p2727_p7 }
  0x58   : > { %p2419_p1 = por %p2418_p0, %p2417_p13 }
  0x59   : > { %p2413_p12 = pneg %p2412_p11 }
  0x5b   : > { %p2420_p4 = pnand %p2419_p1, %p2413_p12 }
  0x5d   : > { %2423 = shalt.err (!%p2420_p4)
}
  0x5e   : > { %2258 = dma.hbm_to_vmem [thread:$0]  (!%p2713_p5), %s3091_s14, 16, %s2717_s17, [#allocation12]  }
  0x5f   : > { %s42_s29 = sadd.s32 1, %s2570_s22  ;;  %s2579_s16 = smov [#allocation3]  }
  0x60   : > { %p44_p6 = scmp.ge.s32.totalorder %s42_s29, 2  ;;  %s451_s24 = sshll.u32 %s2579_s16, 4  ;;  %s452_s24 = int_to_ptr.vmem [resolvable:$true] %s451_s24 }
  0x61   : > { %s2424_s20 = scalar_lea.hbm %s3084_s7, 16 }
  0x62   : > { %s3123_s29 = smov (%p44_p6, %s42_s29), 0  ;;  %p2425_p8 = scmp.ne.s32.totalorder %s3084_s7, %s2424_s20 }
  0x63   : > { %p2431_p3 = scmp.lt.u32.totalorder %s2424_s20, %s3084_s7 }
  0x64   : > { %p2427_p9 = pnand %p2425_p8, %p2727_p7 }
  0x66   : > { %p2428_p2 = pneg %p2427_p9 }
  0x68   : > { %p2433_p10 = pnand %p2431_p3, %p2428_p2 }
  0x6a   : > { %2436 = shalt.err (!%p2433_p10)
}
  0x6b   : > { %s2437_s12 = scalar_lea.vmem %s452_s24, 16  ;;  %s2444_s26 = scalar_lea.vmem %s452_s24, 32 }
  0x6c   : > { %p2438_p11 = scmp.ne.s32.totalorder %s452_s24, %s2437_s12  ;;  %p2445_p0 = scmp.lt.s32.totalorder %s452_s24, %s452_s24 }
  0x6d   : > { %p2446_p1 = scmp.lt.s32.totalorder %s2444_s26, %s2437_s12 }
  0x6e   : > { %p2440_p12 = pnand %p2438_p11, %p2727_p7 }
  0x6f   : > { %p2447_p4 = por %p2446_p1, %p2445_p0 }
  0x70   : > { %p2441_p13 = pneg %p2440_p12 }
  0x72   : > { %p2448_p6 = pnand %p2447_p4, %p2441_p13 }
  0x74   : > { %2451 = shalt.err (!%p2448_p6)
}
  0x75   : > { %2243 = dma.hbm_to_vmem [thread:$0]  (!%p2713_p5), %s3084_s7, 16, %s452_s24, [#allocation4]  }
  0x76   : > { %s2580_s19 = smov [#allocation7]   ;;  %s2581_s25 = smov [#allocation10]  }
  0x77   : > { %s473_s20 = sshll.u32 %s2580_s19, 4  ;;  %s501_s30 = sshll.u32 %s2581_s25, 4  ;;  %s474_s20 = int_to_ptr.vmem [resolvable:$true] %s473_s20  ;;  %s502_s30 = int_to_ptr.vmem [resolvable:$true] %s501_s30 }
  0x78   : > { %s2452_s8 = scalar_lea.hbm %s3086_s9, 16 }
  0x79   : > { %p2453_p8 = scmp.ne.s32.totalorder %s3086_s9, %s2452_s8  ;;  %p2459_p3 = scmp.lt.u32.totalorder %s2452_s8, %s3086_s9 }
  0x7b   : > { %p2455_p9 = pnand %p2453_p8, %p2727_p7 }
  0x7d   : > { %p2456_p2 = pneg %p2455_p9 }
  0x7f   : > { %p2461_p10 = pnand %p2459_p3, %p2456_p2 }
  0x81   : > { %2464 = shalt.err (!%p2461_p10)
}
  0x82   : > { %s2465_s24 = scalar_lea.vmem %s474_s20, 16  ;;  %s2472_s0 = scalar_lea.vmem %s474_s20, 32 }
  0x83   : > { %p2466_p11 = scmp.ne.s32.totalorder %s474_s20, %s2465_s24  ;;  %p2473_p0 = scmp.lt.s32.totalorder %s474_s20, %s474_s20 }
  0x84   : > { %p2474_p1 = scmp.lt.s32.totalorder %s2472_s0, %s2465_s24 }
  0x85   : > { %p2468_p12 = pnand %p2466_p11, %p2727_p7 }
  0x86   : > { %p2475_p4 = por %p2474_p1, %p2473_p0 }
  0x87   : > { %p2469_p13 = pneg %p2468_p12 }
  0x89   : > { %p2476_p6 = pnand %p2475_p4, %p2469_p13 }
  0x8b   : > { %2479 = shalt.err (!%p2476_p6)
}
  0x8c   : > { %2249 = dma.hbm_to_vmem [thread:$0]  (!%p2713_p5), %s3086_s9, 16, %s474_s20, [#allocation6]  }
  0x8d   : > { %s2480_s10 = scalar_lea.hbm %s3090_s13, 16 }
  0x8e   : > { %p2481_p8 = scmp.ne.s32.totalorder %s3090_s13, %s2480_s10  ;;  %p2487_p3 = scmp.lt.u32.totalorder %s2480_s10, %s3090_s13 }
  0x90   : > { %p2483_p9 = pnand %p2481_p8, %p2727_p7 }
  0x92   : > { %p2484_p2 = pneg %p2483_p9 }
  0x94   : > { %p2489_p10 = pnand %p2487_p3, %p2484_p2 }
  0x96   : > { %2492 = shalt.err (!%p2489_p10)
}
  0x97   : > { %s2493_s24 = scalar_lea.vmem %s502_s30, 16  ;;  %s2500_s20 = scalar_lea.vmem %s502_s30, 32 }
  0x98   : > { %p2494_p11 = scmp.ne.s32.totalorder %s502_s30, %s2493_s24  ;;  %p2501_p0 = scmp.lt.s32.totalorder %s502_s30, %s502_s30 }
  0x99   : > { %p2502_p1 = scmp.lt.s32.totalorder %s2500_s20, %s2493_s24 }
  0x9a   : > { %p2496_p12 = pnand %p2494_p11, %p2727_p7 }
  0x9b   : > { %p2503_p4 = por %p2502_p1, %p2501_p0 }
  0x9c   : > { %p2497_p13 = pneg %p2496_p12 }
  0x9e   : > { %p2504_p6 = pnand %p2503_p4, %p2497_p13 }
  0xa0   : > { %2507 = shalt.err (!%p2504_p6)
}
  0xa1   : > { %2255 = dma.hbm_to_vmem [thread:$0]  (!%p2713_p5), %s3090_s13, 16, %s502_s30, [#allocation9]  }
  0xa2   : > { %s2582_s25 = smov [#allocation13]   ;;  %s2508_s17 = scalar_lea.hbm %s3092_s15, 16 }
  0xa3   : > { %s523_s8 = sshll.u32 %s2582_s25, 4  ;;  %p2509_p8 = scmp.ne.s32.totalorder %s3092_s15, %s2508_s17  ;;  %s524_s8 = int_to_ptr.vmem [resolvable:$true] %s523_s8 }
  0xa4   : > { %p2515_p3 = scmp.lt.u32.totalorder %s2508_s17, %s3092_s15 }
  0xa5   : > { %p2511_p9 = pnand %p2509_p8, %p2727_p7 }
  0xa7   : > { %p2512_p2 = pneg %p2511_p9 }
  0xa9   : > { %p2517_p10 = pnand %p2515_p3, %p2512_p2 }
  0xab   : > { %2520 = shalt.err (!%p2517_p10)
}
  0xac   : > { %s2521_s30 = scalar_lea.vmem %s524_s8, 16  ;;  %s2528_s20 = scalar_lea.vmem %s524_s8, 32 }
  0xad   : > { %p2522_p11 = scmp.ne.s32.totalorder %s524_s8, %s2521_s30  ;;  %p2529_p0 = scmp.lt.s32.totalorder %s524_s8, %s524_s8 }
  0xae   : > { %p2530_p1 = scmp.lt.s32.totalorder %s2528_s20, %s2521_s30 }
  0xaf   : > { %p2524_p12 = pnand %p2522_p11, %p2727_p7 }
  0xb0   : > { %p2531_p4 = por %p2530_p1, %p2529_p0 }
  0xb1   : > { %p2525_p13 = pneg %p2524_p12 }
  0xb3   : > { %p2532_p6 = pnand %p2531_p4, %p2525_p13 }
  0xb5   : > { %2535 = shalt.err (!%p2532_p6)
}
  0xb6   : > { %2261 = dma.hbm_to_vmem [thread:$0]  (!%p2713_p5), %s3092_s15, 16, %s524_s8, [#allocation12]  }
  0xb7   : > { %p3113_p8 = scmp.ne.s32.totalorder %s3108_s28, 0 }
  0xb8   : > { %p3114_p9 = scmp.ne.s32.totalorder (!%p3113_p8), %s3107_s27, 0 }
  0xb9   : > { %553 = sbr.rel (%p3113_p8) target bundleno = 2694 (0xa86), region = 84 }
  0xc0   : > { %2549 = dma.done.wait (%p3114_p9), [#allocation4], 16  }
  0xc1   : > { %2551 = vsyncadd (%p3114_p9), [#allocation4], 4294967280 }
  0xc2   : > { %2553 = dma.done.wait (%p3114_p9), [#allocation6], 32  }
  0xc3   : > { %2555 = vsyncadd (%p3114_p9), [#allocation6], 4294967264 }
  0xc4   : > { %2557 = dma.done.wait (%p3114_p9), [#allocation9], 32  }
  0xc5   : > { %2559 = vsyncadd (%p3114_p9), [#allocation9], 4294967264 }
  0xc6   : > { %2561 = dma.done.wait (%p3114_p9), [#allocation12], 32  }
  0xc7   : > { %2563 = vsyncadd (%p3114_p9), [#allocation12], 4294967264  ;;  %p635_p5 = scmp.lt.s32.totalorder %s2566_s21, 1  ;;  %v2583_v0 = vmov 0.0|0.0   ;;  %vm2584_vm0 = vmmov 0   ;;  %v2585_v1 = vmov 0.0  }
  0xc8   : > { %2176 = vmatprep.subr.bf16.mxu1 %v2583_v0  ;;  %2081 = vmatprep.mubr.msk.f32.mxu1 %vm2584_vm0, %v2585_v1  ;;  %v655_v2 = vld [vmem:[%s3079_s2] sm:$0xff]  ;;  %v656_v3 = vld [vmem:[%s3079_s2 + $0x8] sm:$0xff]  ;;  %v657_v4 = vld [vmem:[%s3079_s2 + $0x10] sm:$0xff]  ;;  %s3115_s16 = sld [smem:[#allocation19_spill]]  ;;  %vm666_vm1 = vcmask 261120   ;;  %vm824_vm2 = vcmask 64512  }
  0xc9   : > { %2095 = vmatprep.subr.mxu0 %v2585_v1  ;;  %2097 = vmatprep.mubr.msk.f32.mxu0 %vm2584_vm0, %v2585_v1  ;;  %s3125_s21 = smov (!%p635_p5, %s2566_s21), 1  ;;  %v2177_v5 = vpack.c.bf16 %v656_v3, %v655_v2  ;;  %v658_v6 = vld [vmem:[%s3079_s2 + $0x18] sm:$0xff]  ;;  %v740_v8 = vld [vmem:[%s3081_s4] sm:$0xff]  ;;  %v741_v9 = vld [vmem:[%s3081_s4 + $0x8] sm:$0xff]  ;;  %s2588_s30 = smov 104   ;;  %vm1158_vm3 = vcmask 130112  }
  0xca   : > { %s2904_s17 = sshll.u32 %s3125_s21, 3  ;;  %v2180_v7 = vpack.c.bf16 %v658_v6, %v657_v4  ;;  %v2183_v11 = vpack.c.bf16 %v741_v9, %v740_v8  ;;  %v742_v12 = vld [vmem:[%s3081_s4 + $0x10] sm:$0xff]  ;;  %v743_v13 = vld [vmem:[%s3081_s4 + $0x18] sm:$0xff]  ;;  %v2002_v18 = vld [vmem:[%s3082_s5] ss:$0 sm:$0xff]  ;;  %s2589_s20 = smov 96  }
  0xcb   : > { %2178 = vmatpush3.bf16.msra.mxu1 %v2177_v5  ;;  %v2186_v14 = vpack.c.bf16 %v743_v13, %v742_v12  ;;  %s645_s8 = scalar_lea.vmem %s3078_s1, %s2904_s17  ;;  %v2000_v22 = vld [vmem:[%s3080_s3] ss:$0 sm:$0xff]  ;;  %s2590_s0 = smov 80   ;;  %vm1329_vm4 = vcmask 195712   ;;  %vm1500_vm5 = vcmask 261312   ;;  %vm1717_vm6 = vcmask 523264  }
  0xcc   : > { %2179 = vmatprep.subr.bf16.mxu1 %v2583_v0  ;;  %v654_v15 = vld [vmem:[%s645_s8] sm:$0xff]  ;;  %s2591_s19 = smov 72   ;;  %s2592_s21 = smov 88  }
  0xcd   : > { %s2593_s12 = smov 8   ;;  %s2594_s26 = smov 16  }
  0xce   : > { %s641_s24 = scalar_lea.vmem %s3115_s16, %s2904_s17  ;;  %s2586_s16 = smov 112  }
  0xcf   : > { %2181 = vmatpush3.bf16.msra.mxu1 %v2180_v7  ;;  %v2917_v10 = vld [vmem:[%s641_s24] sm:$0xff]  ;;  %s2587_s24 = smov 120   ;;  %s3117_s8 = sld [smem:[#allocation23_spill]] }
  0xd0   : > { %2182 = vmatprep.subr.bf16.mxu1 %v2583_v0  ;;  %s3118_s10 = sld [smem:[#allocation24_spill]] }
  0xd2   : > { %2082 = vmatmul.mubr.msk.f32.vlgmr.msra.gmra.mrb[0].mxu1 %vm666_vm1, %v2917_v10 }
  0xd3   : > { %2184 = vmatpush3.bf16.msra.mxu1 %v2183_v11  ;;  %2092 = vmatprep.mubr.msk.f32.mxu1 %vm2584_vm0, %v2585_v1 }
  0xd4   : > { %2185 = vmatprep.subr.bf16.mxu1 %v2583_v0 }
  0xd7   : > { %2187 = vmatpush3.bf16.msra.mxu1 %v2186_v14 }
  0xd8   : > { %2100 = vmatprep.subr.mxu1 %v2585_v1 }
  0xda   : > { %2093 = vmatmul.mubr.msk.f32.vlgmr.msra.gmra.mrb[2].mxu1 %vm666_vm1, %v654_v15 }
  0xdb   : > { %2102 = vmatprep.mubr.msk.f32.mxu1 %vm2584_vm0, %v2585_v1 }
 0x1a5   : > { %v736_v16 = vpop.f32.mrb[0].mxu1 }
 0x1a6   : > { %v2083_v17 = vpop.f32.mrb[1].mxu1  ;;  %v737_v23 = vadd.f32 %v2000_v22, %v736_v16  ;;  %v1505_v22 = vld [vmem:[%s3083_s6 + $0x10] sm:$0xff] }
 0x1ad   : > { %v820_v19 = vpop.f32.mrb[2].mxu1 }
 0x1ae   : > { %v2942_v20 = vadd.f32 %v2002_v18, %v820_v19  ;;  %v2094_v21 = vpop.f32.mrb[3].mxu1  ;;  %v1503_v19 = vld [vmem:[%s3083_s6] sm:$0xff] }
 0x1b0   : > { %1162 = vrot.lane.b32.xlu1 %v2942_v20, %s2586_s16  ;;  %991 = vrot.lane.b32.xlu0 %v2942_v20, %s2587_s24 }
 0x1b1   : > { %2096 = vmatpush3.xpose.msk.msra.mxu0 %vm824_vm2, %v2942_v20 }
 0x1b2   : > { %2105 = vmatprep.subr.mxu0 %v2585_v1 }
 0x1b4   : > { %2098 = vmatmul.mubr.msk.f32.vlgmr.msra.gmra.mrb[0].mxu0 %vm824_vm2, %v737_v23  ;;  %1160 = vrot.lane.b32.xlu1 %v737_v23, %s2586_s16  ;;  %s2595_s16 = smov 24  }
 0x1b5   : > { %989 = vrot.lane.b32.xlu0 %v737_v23, %s2587_s24  ;;  %2107 = vmatprep.mubr.msk.f32.mxu0 %vm2584_vm0, %v2585_v1 }
 0x1b8   : > { %1331 = vrot.lane.b32.xlu1 %v737_v23, %s2588_s30  ;;  %v1506_v23 = vld [vmem:[%s3083_s6 + $0x18] sm:$0xff] }
 0x1b9   : > { %1333 = vrot.lane.b32.xlu0 %v2942_v20, %s2588_s30 }
 0x222   : > { %v992_v24 = vpop.permute.xlu0 %991  ;;  %v1163_v25 = vpop.permute.xlu1 %1162 }
 0x223   : > { %2106 = vmatpush3.xpose.msk.msra.mxu0 %vm824_vm2, %v992_v24  ;;  %v2192_v24 = vpack.c.bf16 %v1506_v23, %v1505_v22 }
 0x224   : > { %2115 = vmatprep.subr.mxu0 %v2585_v1 }
 0x226   : > { %v1161_v27 = vpop.permute.xlu1 %1160 }
 0x227   : > { %v990_v26 = vpop.permute.xlu0 %989 }
 0x228   : > { %2108 = vmatmul.mubr.msk.f32.vlgmr.msra.gmra.mrb[2].mxu0 %vm824_vm2, %v990_v26 }
 0x229   : > { %2116 = vmatpush3.xpose.msk.msra.mxu0 %vm824_vm2, %v1163_v25  ;;  %2117 = vmatprep.mubr.msk.f32.mxu0 %vm2584_vm0, %v2585_v1 }
 0x22a   : > { %2125 = vmatprep.subr.mxu0 %v2585_v1  ;;  %v1332_v29 = vpop.permute.xlu1 %1331 }
 0x22b   : > { %v1334_v28 = vpop.permute.xlu0 %1333 }
 0x22c   : > { %2118 = vmatmul.mubr.msk.f32.vlgmr.msra.gmra.mrb[4].mxu0 %vm824_vm2, %v1161_v27 }
 0x22d   : > { %2126 = vmatpush3.xpose.msk.msra.mxu0 %vm824_vm2, %v1334_v28  ;;  %2127 = vmatprep.mubr.msk.f32.mxu0 %vm2584_vm0, %v2585_v1 }
 0x22e   : > { %2188 = vmatprep.subr.bf16.mxu0 %v2583_v0 }
 0x230   : > { %2128 = vmatmul.mubr.msk.f32.vlgmr.msra.gmra.mrb[6].mxu0 %vm824_vm2, %v1332_v29 }
 0x231   : > { %2143 = vmatprep.mubr.msk.f32.mxu0 %vm2584_vm0, %v2585_v1 }
 0x287   : > { %v897_v30 = vpop.f32.mrb[0].mxu0 }
 0x288   : > { %v2099_v31 = vpop.f32.mrb[1].mxu0  ;;  %v901_v32 = vsel %vm824_vm2, %v897_v30, -inf }
 0x289   : > { %902 = vmax.xlane.f32.xlu0 %v901_v32 }
 0x2fb   : > { %v1063_v33 = vpop.f32.mrb[2].mxu0 }
 0x2fc   : > { %v2109_v34 = vpop.f32.mrb[3].mxu0  ;;  %v1067_v35 = vsel %vm824_vm2, %v1063_v33, -inf }
 0x2fd   : > { %1068 = vmax.xlane.f32.xlu1 %v1067_v35  ;;  %v2016_v35 = vld [vmem:[#allocation3] ss:$0 sm:$0xff] }
 0x2ff   : > { %v1234_v36 = vpop.f32.mrb[4].mxu0 }
 0x300   : > { %v2119_v37 = vpop.f32.mrb[5].mxu0  ;;  %v1238_v38 = vsel %vm824_vm2, %v1234_v36, -inf }
 0x301   : > { %1239 = vmax.xlane.f32.xlu0 %v1238_v38 }
 0x303   : > { %v1405_v39 = vpop.f32.mrb[6].mxu0 }
 0x304   : > { %v2129_v40 = vpop.f32.mrb[7].mxu0  ;;  %v1409_v41 = vsel %vm824_vm2, %v1405_v39, -inf }
 0x305   : > { %1410 = vmax.xlane.f32.xlu0 %v1409_v41 }
 0x30e   : > { %912 = vrot.lane.b32.xlu1 %v2942_v20, %s2589_s20  ;;  %s3116_s20 = sld [smem:[#allocation21_spill]] }
 0x316   : > { %v903_v42 = vpop.xlane.xlu0 %902 }
 0x317   : > { %v904_v43 = vsub.f32 %v897_v30, %v903_v42 }
 0x319   : > { %v905_v44 = vmul.f32 1.442695, %v904_v43 }
 0x31b   : > { %2320 = vpow2.f32 %v905_v44 }
 0x325   : > { %v2321_v45 = vpop.eup %2320 }
 0x326   : > { %v907_v46 = vsel %vm824_vm2, %v2321_v45, 0.0 }
 0x332   : > { %908 = vadd.xlane.f32.xlu1 %v907_v46  ;;  %v1619_v46 = vld [vmem:[%s3116_s20 + $0x8] sm:$0xff] }
 0x38a   : > { %v1069_v47 = vpop.xlane.xlu1 %1068 }
 0x38b   : > { %v1070_v48 = vsub.f32 %v1063_v33, %v1069_v47 }
 0x38d   : > { %v1071_v49 = vmul.f32 1.442695, %v1070_v48  ;;  %v1621_v48 = vld [vmem:[%s3116_s20 + $0x18] sm:$0xff] }
 0x38e   : > { %v913_v50 = vpop.permute.xlu1 %912  ;;  %v1240_v51 = vpop.xlane.xlu0 %1239 }
 0x38f   : > { %2322 = vpow2.f32 %v1071_v49  ;;  %v1241_v52 = vsub.f32 %v1234_v36, %v1240_v51  ;;  %2101 = vmatpush3.msra.mxu1 %v913_v50  ;;  %v1702_v50 = vld [vmem:[%s3117_s8] sm:$0xff]  ;;  %v1703_v51 = vld [vmem:[%s3117_s8 + $0x8] sm:$0xff] }
 0x390   : > { %2110 = vmatprep.subr.mxu1 %v2585_v1 }
 0x391   : > { %v1242_v53 = vmul.f32 1.442695, %v1241_v52  ;;  %v1704_v52 = vld [vmem:[%s3117_s8 + $0x10] sm:$0xff] }
 0x392   : > { %v1411_v54 = vpop.xlane.xlu0 %1410 }
 0x393   : > { %2324 = vpow2.f32 %v1242_v53  ;;  %v1412_v55 = vsub.f32 %v1405_v39, %v1411_v54  ;;  %v2201_v53 = vpack.c.bf16 %v1703_v51, %v1702_v50  ;;  %v1705_v54 = vld [vmem:[%s3117_s8 + $0x18] sm:$0xff] }
 0x395   : > { %v1413_v56 = vmul.f32 1.442695, %v1412_v55  ;;  %v2204_v55 = vpack.c.bf16 %v1705_v54, %v1704_v52 }
 0x397   : > { %2326 = vpow2.f32 %v1413_v56  ;;  %v1706_v56 = vld [vmem:[%s3117_s8 + $0x20] sm:$0xff] }
 0x399   : > { %v2323_v57 = vpop.eup %2322 }
 0x39a   : > { %v1073_v58 = vsel %vm824_vm2, %v2323_v57, 0.0 }
 0x39b   : > { %1074 = vadd.xlane.f32.xlu0 %v1073_v58 }
 0x39d   : > { %v2325_v59 = vpop.eup %2324 }
 0x39e   : > { %v1244_v60 = vsel %vm824_vm2, %v2325_v59, 0.0 }
 0x39f   : > { %1245 = vadd.xlane.f32.xlu1 %v1244_v60 }
 0x3a1   : > { %v2327_v61 = vpop.eup %2326 }
 0x3a2   : > { %v1415_v62 = vsel %vm824_vm2, %v2327_v61, 0.0 }
 0x3a3   : > { %1416 = vadd.xlane.f32.xlu0 %v1415_v62 }
 0x3b0   : > { %1249 = vrot.lane.b32.xlu1 %v2942_v20, %s2590_s0 }
 0x3b4   : > { %1420 = vrot.lane.b32.xlu1 %v2942_v20, %s2591_s19 }
 0x3b9   : > { %1078 = vrot.lane.b32.xlu0 %v2942_v20, %s2592_s21  ;;  %v1504_v20 = vld [vmem:[%s3083_s6 + $0x8] sm:$0xff] }
 0x3ba   : > { %v2189_v21 = vpack.c.bf16 %v1504_v20, %v1503_v19 }
 0x3bc   : > { %2190 = vmatpush3.bf16.msra.mxu0 %v2189_v21 }
 0x3bd   : > { %2191 = vmatprep.subr.bf16.mxu0 %v2583_v0 }
 0x3bf   : > { %v909_v63 = vpop.xlane.xlu1 %908 }
 0x3c0   : > { %2328 = vrcp.f32 %v909_v63  ;;  %2193 = vmatpush3.bf16.msra.mxu0 %v2192_v24  ;;  %v2018_v63 = vld [vmem:[#allocation5] ss:$0 sm:$0xff] }
 0x3c1   : > { %2200 = vmatprep.subr.bf16.mxu0 %v2583_v0 }
 0x3ca   : > { %v2329_v2 = vpop.eup %2328 }
 0x3cb   : > { %v911_v3 = vmul.f32 %v2329_v2, %v2321_v45 }
 0x3cd   : > { %2103 = vmatmul.mubr.msk.f32.vlgmr.msra.gmra.mrb[4].mxu1 %vm824_vm2, %v911_v3  ;;  %v2019_v3 = vld [vmem:[#allocation7] ss:$0 sm:$0xff] }
 0x3ce   : > { %2112 = vmatprep.mubr.msk.f32.mxu1 %vm2584_vm0, %v2585_v1 }
 0x428   : > { %v1075_v4 = vpop.xlane.xlu0 %1074 }
 0x429   : > { %2330 = vrcp.f32 %v1075_v4 }
 0x42c   : > { %v1246_v5 = vpop.xlane.xlu1 %1245 }
 0x42d   : > { %2332 = vrcp.f32 %v1246_v5 }
 0x430   : > { %v1417_v6 = vpop.xlane.xlu0 %1416  ;;  %v1250_v9 = vpop.permute.xlu1 %1249 }
 0x431   : > { %2334 = vrcp.f32 %v1417_v6  ;;  %v1708_v6 = vld [vmem:[%s3117_s8 + $0x30] sm:$0xff] }
 0x433   : > { %v2331_v7 = vpop.eup %2330 }
 0x434   : > { %v1077_v8 = vmul.f32 %v2331_v7, %v2323_v57  ;;  %v1079_v11 = vpop.permute.xlu0 %1078  ;;  %v1421_v14 = vpop.permute.xlu1 %1420  ;;  %v1707_v57 = vld [vmem:[%s3117_s8 + $0x28] sm:$0xff] }
 0x435   : > { %2111 = vmatpush3.msra.mxu1 %v1079_v11  ;;  %v2207_v58 = vpack.c.bf16 %v1707_v57, %v1706_v56 }
 0x436   : > { %2113 = vmatmul.mubr.msk.f32.vlgmr.msra.gmra.mrb[6].mxu1 %vm824_vm2, %v1077_v8  ;;  %2120 = vmatprep.subr.mxu1 %v2585_v1  ;;  %v2020_v8 = vld [vmem:[#allocation8] ss:$0 sm:$0xff] }
 0x437   : > { %v2333_v12 = vpop.eup %2332  ;;  %2121 = vmatpush3.msra.mxu1 %v1250_v9  ;;  %2122 = vmatprep.mubr.msk.f32.mxu1 %vm2584_vm0, %v2585_v1 }
 0x438   : > { %v1248_v13 = vmul.f32 %v2333_v12, %v2325_v59  ;;  %2130 = vmatprep.subr.mxu1 %v2585_v1 }
 0x43a   : > { %2123 = vmatmul.mubr.msk.f32.vlgmr.msra.gmra.mrb[8].mxu1 %vm824_vm2, %v1248_v13  ;;  %v2022_v13 = vld [vmem:[#allocation10] ss:$0 sm:$0xff] }
 0x43b   : > { %v2335_v15 = vpop.eup %2334  ;;  %2131 = vmatpush3.msra.mxu1 %v1421_v14  ;;  %2132 = vmatprep.mubr.msk.f32.mxu1 %vm2584_vm0, %v2585_v1 }
 0x43c   : > { %v1419_v16 = vmul.f32 %v2335_v15, %v2327_v61  ;;  %2194 = vmatprep.subr.bf16.mxu1 %v2583_v0 }
 0x43e   : > { %2133 = vmatmul.mubr.msk.f32.vlgmr.msra.gmra.mrb[10].mxu1 %vm824_vm2, %v1419_v16 }
 0x43f   : > { %2154 = vmatprep.mubr.msk.f32.mxu1 %vm2584_vm0, %v2585_v1 }
 0x4a0   : > { %v984_v17 = vpop.f32.mrb[4].mxu1 }
 0x4a1   : > { %988 = vst.msk [vmem:[#allocation2] sm:$0xff] %vm824_vm2, %v984_v17  ;;  %v2104_v18 = vpop.f32.mrb[5].mxu1 }
 0x509   : > { %v1150_v25 = vpop.f32.mrb[6].mxu1 }
 0x50a   : > { %1155 = vrot.lane.b32.xlu0 %v1150_v25, %s2593_s12  ;;  %v2114_v26 = vpop.f32.mrb[7].mxu1  ;;  %s652_s12 = scalar_lea.vmem %s3118_s10, %s2904_s17 }
 0x50d   : > { %v1321_v27 = vpop.f32.mrb[8].mxu1 }
 0x50e   : > { %1326 = vrot.lane.b32.xlu1 %v1321_v27, %s2594_s26  ;;  %v2124_v28 = vpop.f32.mrb[9].mxu1 }
 0x50f   : > { %v2024_v28 = vld [vmem:[#allocation11] ss:$0 sm:$0xff] }
 0x511   : > { %v1492_v29 = vpop.f32.mrb[10].mxu1 }
 0x512   : > { %1497 = vrot.lane.b32.xlu0 %v1492_v29, %s2595_s16  ;;  %v2134_v30 = vpop.f32.mrb[11].mxu1 }
 0x513   : > { %v2025_v30 = vld [vmem:[#allocation13] ss:$0 sm:$0xff] }
 0x57c   : > { %v1156_v31 = vpop.permute.xlu0 %1155 }
 0x57d   : > { %1159 = vst.msk [vmem:[#allocation2] sm:$0xff] %vm1158_vm3, %v1156_v31 }
 0x580   : > { %v1327_v32 = vpop.permute.xlu1 %1326 }
 0x581   : > { %1330 = vst.msk [vmem:[#allocation2] sm:$0xff] %vm1329_vm4, %v1327_v32 }
 0x584   : > { %v1498_v33 = vpop.permute.xlu0 %1497 }
 0x585   : > { %1501 = vst.msk [vmem:[#allocation2] sm:$0xff] %vm1500_vm5, %v1498_v33 }
 0x58c   : > { %v1502_v34 = vld [vmem:[#allocation2] sm:$0xff] }
 0x58d   : > { %2144 = vmatmul.mubr.msk.f32.vlgmr.msra.gmra.mrb[8].mxu0 %vm666_vm1, %v1502_v34 }
 0x58e   : > { %2173 = vmatprep.mubr.msk.f32.mxu0 %vm2584_vm0, %v2585_v1  ;;  %v1618_v1 = vld [vmem:[%s3116_s20] sm:$0xff]  ;;  %2202 = vmatpush3.bf16.msra.mxu0 %v2201_v53 }
 0x58f   : > { %v2195_v47 = vpack.c.bf16 %v1619_v46, %v1618_v1  ;;  %2203 = vmatprep.subr.bf16.mxu0 %v2583_v0 }
 0x591   : > { %2196 = vmatpush3.bf16.msra.mxu1 %v2195_v47 }
 0x592   : > { %2197 = vmatprep.subr.bf16.mxu1 %v2583_v0  ;;  %2205 = vmatpush3.bf16.msra.mxu0 %v2204_v55 }
 0x593   : > { %2206 = vmatprep.subr.bf16.mxu0 %v2583_v0 }
 0x596   : > { %2208 = vmatpush3.bf16.msra.mxu0 %v2207_v58 }
 0x597   : > { %2209 = vmatprep.subr.bf16.mxu0 %v2583_v0  ;;  %v1709_v0 = vld [vmem:[%s3117_s8 + $0x38] sm:$0xff] }
 0x598   : > { %v2210_v7 = vpack.c.bf16 %v1709_v0, %v1708_v6 }
 0x59a   : > { %2211 = vmatpush3.bf16.msra.mxu0 %v2210_v7 }
 0x660   : > { %v1583_v36 = vpop.f32.mrb[8].mxu0 }
 0x661   : > { %v1584_v37 = vadd.f32 %v2016_v35, %v1583_v36  ;;  %v2145_v38 = vpop.f32.mrb[9].mxu0 }
 0x663   : > { %v1587_v39 = vadd.f32 %v1584_v37, %v2917_v10  ;;  %v1620_v10 = vld [vmem:[%s3116_s20 + $0x10] sm:$0xff] }
 0x664   : > { %v2198_v49 = vpack.c.bf16 %v1621_v48, %v1620_v10 }
 0x665   : > { %v1588_v40 = vsel %vm666_vm1, %v1587_v39, 0.0 }
 0x666   : > { %1589 = vadd.xlane.f32.xlu1 %v1588_v40  ;;  %2199 = vmatpush3.bf16.msra.mxu1 %v2198_v49 }
 0x6f3   : > { %v1590_v41 = vpop.xlane.xlu1 %1589 }
 0x6f4   : > { %v1592_v42 = vmul.f32 0.03125, %v1590_v41 }
 0x6f6   : > { %v1593_v43 = vsub.f32 %v1587_v39, %v1592_v42 }
 0x6f8   : > { %v1594_v44 = vmul.f32 %v1593_v43, %v1593_v43 }
 0x6fa   : > { %v1595_v45 = vsel %vm666_vm1, %v1594_v44, 0.0 }
 0x6fb   : > { %1596 = vadd.xlane.f32.xlu0 %v1595_v45 }
 0x788   : > { %v1597_v59 = vpop.xlane.xlu0 %1596 }
 0x789   : > { %v1598_v60 = vmul.f32 0.03125, %v1597_v59 }
 0x78b   : > { %v1599_v61 = vadd.f32 1e-05, %v1598_v60 }
 0x78d   : > { %2336 = vrsqrt.f32 %v1599_v61 }
 0x797   : > { %v2337_v62 = vpop.eup %2336 }
 0x798   : > { %v1601_v2 = vmul.f32 %v2337_v62, %v1593_v43 }
 0x79a   : > { %v1609_v4 = vmul.f32 %v2018_v63, %v1601_v2 }
 0x79c   : > { %v1617_v5 = vadd.f32 %v2019_v3, %v1609_v4 }
 0x79e   : > { %2155 = vmatmul.mubr.msk.f32.vlgmr.msra.gmra.mrb[12].mxu1 %vm666_vm1, %v1617_v5 }
 0x871   : > { %v1698_v9 = vpop.f32.mrb[12].mxu1 }
 0x872   : > { %v1699_v11 = vadd.f32 %v2020_v8, %v1698_v9  ;;  %v2156_v12 = vpop.f32.mrb[13].mxu1 }
 0x874   : > { %2174 = vmatmul.mubr.msk.f32.vlgmr.msra.gmra.mrb[10].mxu0 %vm1717_vm6, %v1699_v11 }
 0x947   : > { %v1787_v14 = vpop.f32.mrb[10].mxu0 }
 0x948   : > { %v1788_v15 = vadd.f32 %v2022_v13, %v1787_v14  ;;  %v2175_v16 = vpop.f32.mrb[11].mxu0 }
 0x94a   : > { %v1791_v17 = vadd.f32 %v1788_v15, %v1617_v5 }
 0x94c   : > { %v1792_v18 = vsel %vm666_vm1, %v1791_v17, 0.0 }
 0x94d   : > { %1793 = vadd.xlane.f32.xlu0 %v1792_v18 }
 0x9da   : > { %v1794_v19 = vpop.xlane.xlu0 %1793 }
 0x9db   : > { %v1795_v20 = vmul.f32 0.03125, %v1794_v19 }
 0x9dd   : > { %v1796_v21 = vsub.f32 %v1791_v17, %v1795_v20 }
 0x9df   : > { %v1797_v22 = vmul.f32 %v1796_v21, %v1796_v21 }
 0x9e1   : > { %v1798_v23 = vsel %vm666_vm1, %v1797_v22, 0.0 }
 0x9e2   : > { %1799 = vadd.xlane.f32.xlu1 %v1798_v23 }
 0xa6f   : > { %v1800_v24 = vpop.xlane.xlu1 %1799 }
 0xa70   : > { %v1801_v25 = vmul.f32 0.03125, %v1800_v24 }
 0xa72   : > { %v1802_v26 = vadd.f32 1e-05, %v1801_v25 }
 0xa74   : > { %2338 = vrsqrt.f32 %v1802_v26 }
 0xa7e   : > { %v2339_v27 = vpop.eup %2338 }
 0xa7f   : > { %v1804_v29 = vmul.f32 %v2339_v27, %v1796_v21 }
 0xa81   : > { %v1812_v31 = vmul.f32 %v2024_v28, %v1804_v29 }
 0xa83   : > { %v1820_v32 = vadd.f32 %v2025_v30, %v1812_v31 }
 0xa85   : > { %1821 = vst.msk [vmem:[%s652_s12] sm:$0xff] %vm666_vm1, %v1820_v32 }
 0xa86 PF: > { %s3119_s26 = sld [smem:[#allocation18_spill]]  ;;  %s3120_s21 = smov %s2570_s22 }
 0xa87   : > { %s3121_s22 = smov %s3123_s29 }
 0xa8c   : > { %s30_s23 = sadd.s32 1, %s3119_s26  }
 0xa8d   : > { %p27_p7 = scmp.ge.s32.totalorder %s30_s23, 4  }
 0xa8f   :  { %29 = sbr.rel (!%p27_p7) target bundleno = 12 (0xc), region = 146 }
 0xa96   :  { %1847 = vsyncpa [#allocation4], 1 }
 0xa97   :  { %1849 = vsyncpa [#allocation4 + $0x1], 1 }
 0xa98   :  { %1850 = vsyncpa [#allocation6], 1 }
 0xa99   :  { %1851 = vsyncpa [#allocation9], 1 }
 0xa9a   :  { %1852 = vsyncpa [#allocation12], 1 }

</bundles_post_ra>
